<compile_context>
chip_gen: v7x
topology: tpu7x:2x2x1
jax: 0.10.0
libtpu: 0.0.40
codegen_flags: <defaults>
</compile_context>

<pallas_src>
import jax
import jax.numpy as jnp
from jax.experimental import pallas as pl
from jax.experimental.pallas import tpu as pltpu


def _spatial_silu_kernel(x_ref, wb_ref, o_ref):
    # x_ref: (c_tile, s_tile); wb_ref: (c_tile, 2) with [:,0]=weight, [:,1]=bias.
    x = x_ref[...]
    w = wb_ref[:, 0:1]        # (c_tile, 1) -> broadcast along lanes
    b = wb_ref[:, 1:2]
    t = (w * x + b) * x       # depthwise 1x1 conv output times x
    o_ref[...] = (x * jax.nn.sigmoid(t)).astype(o_ref.dtype)


def _largest_aligned_divisor(n, cap, align):
    """Largest divisor of `n` that is a multiple of `align` and <= cap.

    Assumes n % align == 0.
    """
    best = align
    t = align
    limit = min(n, cap)
    while t <= limit:
        if n % t == 0:
            best = t
        t += align
    return best


def _tile_plan(C, S, dtype):
    """Pick (c_tile, s_tile, S_pad) for a lane-dense (C, S) elementwise kernel."""
    itemsize = jnp.dtype(dtype).itemsize
    # dtype-aware sublane alignment (sub-32-bit dtypes pack along sublanes)
    sub_align = {4: 8, 2: 16, 1: 32}.get(itemsize, 8)

    # Channel tile: tile large aligned channel counts; otherwise use the full
    # dim (a block equal to the full array dim is always legal).
    if C % sub_align == 0 and C > 256:
        c_tile = _largest_aligned_divisor(C, 256, sub_align)
    else:
        c_tile = C

    # Spatial tile: target ~2 MiB x blocks (4x that when double-buffering
    # in+out stays under v5e's 16 MiB scoped-VMEM default), rounded to a
    # multiple of 128 so stores are lane-dense.
    target_block_bytes = 2 * 1024 * 1024
    s_pad128 = -(-S // 128) * 128
    s_target = (target_block_bytes // max(1, c_tile * itemsize)) // 128 * 128
    s_target = max(128, s_target)
    if s_pad128 >= 256:
        # Keep >= 2 spatial grid steps so pipelining / v7x core sharding engage.
        s_target = min(s_target, max(128, (s_pad128 // 2) // 128 * 128))
    s_tile = min(s_target, s_pad128)

    # Pad S up to a multiple of s_tile -> exact grid, unmasked stores.
    S_pad = -(-S // s_tile) * s_tile
    return c_tile, s_tile, S_pad


def spatial_silu_forward(x, weight, bias):
    """x: (C, H, W); weight/bias: (C,) depthwise-1x1-conv params.

    Returns (1, C, H, W), matching the PyTorch module's output shape.
    """
    C, H, W = x.shape
    S = H * W
    dtype = x.dtype
    itemsize = jnp.dtype(dtype).itemsize

    c_tile, s_tile, S_pad = _tile_plan(C, S, dtype)

    x2d = x.reshape(C, S)
    if S_pad != S:
        x2d = jnp.pad(x2d, ((0, 0), (0, S_pad - S)))

    # Fold weight and bias into one tiny (C, 2) resident input.
    wb = jnp.stack([weight.astype(dtype), bias.astype(dtype)], axis=-1)

    grid = (C // c_tile, S_pad // s_tile)

    cost = pl.CostEstimate(
        flops=4 * C * S_pad,
        transcendentals=C * S_pad,
        bytes_accessed=(2 * C * S_pad + 2 * C) * itemsize,
    )

    out2d = pl.pallas_call(
        _spatial_silu_kernel,
        out_shape=jax.ShapeDtypeStruct((C, S_pad), dtype),
        grid_spec=pltpu.PrefetchScalarGridSpec(
            num_scalar_prefetch=0,
            grid=grid,
            in_specs=[
                pl.BlockSpec((c_tile, s_tile), lambda i, j: (i, j)),
                pl.BlockSpec((c_tile, 2), lambda i, j: (i, 0)),
            ],
            out_specs=pl.BlockSpec((c_tile, s_tile), lambda i, j: (i, j)),
        ),
        compiler_params=pltpu.CompilerParams(
            dimension_semantics=("parallel", "parallel"),
        ),
        cost_estimate=cost,
    )(x2d, wb)

    if S_pad != S:
        out2d = out2d[:, :S]
    return out2d.reshape(1, C, H, W)


def spatial_silu_reference(x, weight, bias):
    """Pure-JAX reference mirroring the PyTorch forward."""
    xu = x[None]                                    # (1, C, H, W)
    w = weight.reshape(1, -1, 1, 1)
    b = bias.reshape(1, -1, 1, 1)
    weights = w * xu + b                            # depthwise 1x1 conv
    return xu * jax.nn.sigmoid(weights * xu)


if __name__ == "__main__":
    # Module input is (C, H, W): forward unsqueezes to (1, C, H, W).
    C, H, W = 4, 16, 16
    key = jax.random.PRNGKey(0)
    kx, kw, kb = jax.random.split(key, 3)

    x = jax.random.normal(kx, (C, H, W), dtype=jnp.float32)
    # Conv2d(C, C, 1, groups=C): one scalar weight per channel + bias.
    weight = 0.5 * jax.random.normal(kw, (C,), dtype=jnp.float32)
    bias = 0.1 * jax.random.normal(kb, (C,), dtype=jnp.float32)

    out = spatial_silu_forward(x, weight, bias)
    out = jax.block_until_ready(out)

    ref = spatial_silu_reference(x, weight, bias)
    assert out.shape == (1, C, H, W)
    assert jnp.allclose(out, ref, atol=1e-5, rtol=1e-5), (
        float(jnp.max(jnp.abs(out - ref)))
    )
    print("KERNEL_OK")
</pallas_src>

<mosaic_0001>
module attributes {stable_mosaic.version = 11 : i64} {
  func.func @_spatial_silu_kernel(%arg0: i32, %arg1: i32, %arg2: memref<4x128xf32, #tpu.memory_space<vmem>>, %arg3: memref<4x2xf32, #tpu.memory_space<vmem>>, %arg4: memref<4x128xf32, #tpu.memory_space<vmem>>) attributes {dimension_semantics = [#tpu.dimension_semantics<parallel>, #tpu.dimension_semantics<parallel>], iteration_bounds = array<i64: 1, 2>, scalar_prefetch = 0 : i64, scratch_operands = 0 : i64, tpu.core_type = #tpu.core_type<tc>, window_params = [{transform_indices = @transform_0, window_bounds = array<i64: 4, 128>}, {transform_indices = @transform_1, window_bounds = array<i64: 4, 2>}, {transform_indices = @transform_2, window_bounds = array<i64: 4, 128>}]} {
    %c0 = arith.constant 0 : index
    %c0_0 = arith.constant 0 : index
    %0 = vector.load %arg2[%c0, %c0_0] : memref<4x128xf32, #tpu.memory_space<vmem>>, vector<4x128xf32>
    %c0_1 = arith.constant 0 : index
    %c0_2 = arith.constant 0 : index
    %1 = vector.load %arg3[%c0_1, %c0_2] : memref<4x2xf32, #tpu.memory_space<vmem>>, vector<4x1xf32>
    %c0_3 = arith.constant 0 : index
    %c1 = arith.constant 1 : index
    %2 = vector.load %arg3[%c0_3, %c1] : memref<4x2xf32, #tpu.memory_space<vmem>>, vector<4x1xf32>
    %3 = vector.broadcast %1 : vector<4x1xf32> to vector<4x128xf32>
    %4 = arith.mulf %3, %0 : vector<4x128xf32>
    %5 = vector.broadcast %2 : vector<4x1xf32> to vector<4x128xf32>
    %6 = arith.addf %4, %5 : vector<4x128xf32>
    %7 = arith.mulf %6, %0 : vector<4x128xf32>
    %8 = arith.negf %7 : vector<4x128xf32>
    %9 = math.exp %8 : vector<4x128xf32>
    %cst = arith.constant 1.000000e+00 : f32
    %10 = vector.broadcast %cst : f32 to vector<4x128xf32>
    %11 = arith.addf %10, %9 : vector<4x128xf32>
    %12 = arith.divf %10, %11 : vector<4x128xf32>
    %13 = arith.mulf %0, %12 : vector<4x128xf32>
    %c0_4 = arith.constant 0 : index
    %c0_5 = arith.constant 0 : index
    %14 = vector.load %arg4[%c0_4, %c0_5] : memref<4x128xf32, #tpu.memory_space<vmem>>, vector<4x128xf32>
    tpu.vector_store %arg4[%c0_4, %c0_5], %13 {strides = array<i32>} : memref<4x128xf32, #tpu.memory_space<vmem>>, vector<4x128xf32>,
    return
  }
  func.func @transform_0(%arg0: i32, %arg1: i32) -> (i32, i32) {
    %c0_i32 = arith.constant 0 : i32
    return %arg0, %arg1 : i32, i32
  }
  func.func @transform_1(%arg0: i32, %arg1: i32) -> (i32, i32) {
    %c0_i32 = arith.constant 0 : i32
    %c0_i32_0 = arith.constant 0 : i32
    return %arg0, %c0_i32 : i32, i32
  }
  func.func @transform_2(%arg0: i32, %arg1: i32) -> (i32, i32) {
    %c0_i32 = arith.constant 0 : i32
    return %arg0, %arg1 : i32, i32
  }
}

</mosaic_0001>

<bundles_post_ra>
// kernel: tpu_custom_call.1
= control target key start
LH: loop header
LB: loop body
LE: loop exit
PB: predicated region body
PF: predicated region fallthrough
CT: control target
= control target key end

     0   :  { %7 = vsyncpa [#allocation3], 0  ;;  %s722_s0 = inlined_call_operand.hbm [shape: f32[4,256], index: 0, kind: input, shape index: {}]   ;;  %s723_s1 = inlined_call_operand.vmem [shape: f32[4,2], index: 1, kind: input, shape index: {}]   ;;  %s724_s2 = inlined_call_operand.hbm [shape: f32[4,256], index: 2, kind: output, shape index: {}]  }
   0x1   :  { %9 = vsyncpa [#allocation3 + $0x1], 0 }
   0x2   :  { %10 = vsyncpa [#allocation4], 0 }
   0x3   :  { %12 = vsyncpa [#allocation4 + $0x1], 0  ;;  %s547_s9 = smov 0   ;;  %s549_s10 = smov 0  }
   0x4   :  { %s551_s11 = smov 0   ;;  %s553_s12 = smov 0  }
   0x5   :  { %s555_s13 = smov 0   ;;  %s557_s14 = smov 0  }
   0x6 LB: > { %s329_s15 = sadd.s32 4294967295, %s526_s14   ;;  %s330_s16 = sadd.s32 4294967294, %s526_s14   ;;  %s526_s14 = sphi %s557_s14, %s18_s14   ;;  %s522_s13 = sphi %s555_s13, %s740_s13   ;;  %s518_s12 = sphi %s553_s12, %s739_s12   ;;  %s514_s11 = sphi %s551_s11, %s738_s11   ;;  %s510_s10 = sphi %s549_s10, %s737_s10   ;;  %s506_s9 = sphi %s547_s9, %s736_s9  }
   0x7   : > { %s27_s17 = sadd.s32 1, %s522_s13  ;;  %s39_s18 = sadd.s32 1, %s514_s11 }
   0x8   : > { %p28_p0 = scmp.ge.s32.totalorder %s27_s17, 2  ;;  %p46_p1 = scmp.ne.s32.totalorder %s514_s11, %s510_s10 }
   0x9   : > { %p47_p2 = scmp.eq.s32.totalorder %s526_s14, 0  ;;  %p52_p3 = scmp.ne.s32.totalorder %s510_s10, %s506_s9 }
   0xa   : > { %s742_s17 = smov (%p28_p0, %s27_s17), 0  ;;  %p53_p5 = scmp.eq.s32.totalorder %s329_s15, 0 }
   0xb   : > { %p588_p4 = por %p47_p2, %p46_p1  ;;  %s35_s20 = ssub.s32 %s522_s13, %s742_s17 }
   0xc   : > { %p104_p6 = scmp.eq.s32.totalorder %s329_s15, 1  ;;  %p37_p7 = scmp.eq.s32.totalorder %s35_s20, 0 }
   0xd   : > { %p594_p8 = por %p53_p5, %p52_p3  ;;  %p110_p10 = scmp.eq.s32.totalorder %s330_s16, 1 }
   0xe   : > { %p598_p9 = por %p104_p6, %p46_p1  ;;  %p356_p13 = scmp.lt.s32.totalorder %s526_s14, 2 }
   0xf   : > { %s603_s23 = scalar_select %p37_p7, %s514_s11, %s39_s18  }
  0x10   : > { %s728_s22 = scalar_select %p598_p9, 1, 0 }
  0x11   : > { %p605_p11 = por %p110_p10, %p52_p3  ;;  %s137_s25 = sand.u32 1, %s514_s11  }
  0x12   : > { %s334_s26 = sshll.u32 %s137_s25, 2  ;;  %s335_s27 = sshll.u32 %s522_s13, 6 }
  0x13   : > { %s729_s24 = scalar_select %p605_p11, 1, 0 }
  0x14   : > { %s616_s30 = scalar_lea.hbm %s722_s0, %s335_s27  ;;  %s141_s3 = scalar_lea.vmem [#allocation2], %s334_s26 }
  0x15   : > { %s150_s4 = sshll.u32 %s141_s3, 4  ;;  %p622_p0 = pnand %p356_p13, %p588_p4  ;;  %s618_s4 = int_to_ptr.vmem [resolvable:$true] %s150_s4 }
  0x16   : > { %s138_s6 = scalar_lea.sflag [#allocation3], %s137_s25  ;;  %s414_s7 = scalar_lea.hbm %s616_s30, 64 }
  0x17   : > { %p415_p3 = scmp.ne.s32.totalorder %s616_s30, %s414_s7  ;;  %p416_p5 = pneg %p622_p0 }
  0x18   : > { %s419_s16 = scalar_lea.hbm %s722_s0, 128  ;;  %p420_p4 = scmp.lt.u32.totalorder %s616_s30, %s722_s0 }
  0x19   : > { %p417_p6 = pnand %p416_p5, %p415_p3  ;;  %p421_p10 = scmp.lt.u32.totalorder %s419_s16, %s414_s7 }
  0x1a   : > { %p423_p12 = scmp.lt.u32.totalorder %s414_s7, %s616_s30 }
  0x1b   : > { %p418_p7 = pneg %p417_p6  ;;  %p422_p13 = por %p421_p10, %p420_p4 }
  0x1d   : > { %p424_p1 = por %p423_p12, %p422_p13 }
  0x1f   : > { %p425_p2 = pnand %p424_p1, %p418_p7 }
  0x21   : > { %428 = shalt.err (!%p425_p2)
}
  0x22   : > { %s429_s20 = scalar_lea.vmem %s618_s4, 64  ;;  %s528_s25 = smov [#allocation2]  }
  0x23   : > { %p430_p3 = scmp.ne.s32.totalorder %s618_s4, %s429_s20  ;;  %s434_s26 = sshll.u32 %s528_s25, 4  ;;  %s435_s26 = int_to_ptr.vmem [resolvable:$false] %s434_s26 }
  0x24   : > { %s436_s27 = scalar_lea.vmem %s435_s26, 128  ;;  %p437_p9 = scmp.lt.s32.totalorder %s618_s4, %s435_s26 }
  0x25   : > { %p432_p6 = pnand %p430_p3, %p416_p5  ;;  %p438_p4 = scmp.lt.s32.totalorder %s436_s27, %s429_s20 }
  0x27   : > { %p433_p11 = pneg %p432_p6  ;;  %p439_p10 = por %p438_p4, %p437_p9 }
  0x29   : > { %p440_p12 = pnand %p439_p10, %p433_p11 }
  0x2b   : > { %443 = shalt.err (!%p440_p12)
}
  0x2c   : > { %351 = dma.hbm_to_vmem [thread:$0]  (!%p622_p0), %s616_s30, 64, %s618_s4, %s138_s6  }
  0x2d   : > { %p731_p1 = scmp.lt.s32.totalorder %s526_s14, 3  ;;  %p732_p2 = scmp.ge.s32.totalorder %s526_s14, 1 }
  0x2f   : > { %p156_p5 = pnand %p732_p2, %p731_p1 }
  0x30   : > { %s658_s28 = sand.u32 (!%p156_p5), 1, %s510_s10  }
  0x31   : > { %159 = sbr.rel (%p156_p5) target bundleno = 238 (0xee), region = 28  ;;  %s337_s29 = sshll.u32 (!%p156_p5), %s658_s28, 2 }
  0x32   : > { %s162_s3 = scalar_lea.sflag (!%p156_p5), [#allocation3], %s658_s28  ;;  %s165_s7 = scalar_lea.vmem (!%p156_p5), [#allocation2], %s337_s29 }
  0x38   : > { %497 = dma.done.wait (%p594_p8), %s162_s3, 64  }
  0x39   : > { %499 = vsyncadd (%p594_p8), %s162_s3, 4294967232  ;;  %v529_v0 = vmov 0   ;;  %v195_v1 = vld [vmem:[%s723_s1] sm:$0xf]  ;;  %v530_v2 = vmov 1   ;;  %s341_s21 = sshll.u32 %s518_s12, 6 }
  0x3a   : > { %408 = vset.pattern.permute.xlu0 %v529_v0  ;;  %v194_v4 = vld [vmem:[%s165_s7] sm:$0xf]  ;;  %s189_s5 = scalar_lea.vmem [#allocation5], %s337_s29  ;;  %s673_s16 = scalar_lea.hbm %s724_s2, %s341_s21 }
  0x3b   : > { %198 = vperm.xlu0 %408, %v195_v1   ;;  %s232_s6 = sshll.u32 %s189_s5, 4  ;;  %s217_s18 = scalar_lea.sflag [#allocation4], %s658_s28  ;;  %s675_s6 = int_to_ptr.vmem [resolvable:$true] %s232_s6 }
  0x3c   : > { %s444_s19 = scalar_lea.vmem %s675_s6, 64  ;;  %p733_p9 = scmp.ne.s32.totalorder %s728_s22, 0 }
  0x3d   : > { %p445_p8 = scmp.ne.s32.totalorder %s675_s6, %s444_s19  ;;  %s531_s12 = smov [#allocation5]  }
  0x3e   : > { %s448_s20 = sshll.u32 %s531_s12, 4  ;;  %s449_s20 = int_to_ptr.vmem [resolvable:$false] %s448_s20 }
  0x3f   : > { %409 = vset.pattern.permute.xlu0 %v530_v2  ;;  %p446_p11 = pnand %p445_p8, %p733_p9  ;;  %s450_s25 = scalar_lea.vmem %s449_s20, 128 }
  0x40   : > { %203 = vperm.xlu0 %409, %v195_v1   ;;  %p451_p7 = scmp.lt.s32.totalorder %s675_s6, %s449_s20  ;;  %p452_p13 = scmp.lt.s32.totalorder %s450_s25, %s444_s19 }
  0x41   : > { %p447_p0 = pneg %p446_p11 }
  0x42   : > { %p453_p3 = por %p452_p13, %p451_p7 }
  0x44   : > { %p454_p6 = pnand %p453_p3, %p447_p0 }
  0xba   : > { %v199_v3 = vpop.permute.xlu0 %198 }
  0xbb   : > { %v201_v5 = vmul.f32 %v199_v3, %v194_v4 }
  0xbf   : > { %v204_v6 = vpop.permute.xlu0 %203 }
  0xc0   : > { %v206_v7 = vadd.f32 %v204_v6, %v201_v5 }
  0xc2   : > { %v207_v8 = vmul.f32 %v206_v7, %v194_v4 }
  0xc4   : > { %v339_v9 = vmul.f32 -1.442695, %v207_v8 }
  0xc6   : > { %410 = vpow2.f32 %v339_v9 }
  0xd0   : > { %v411_v10 = vpop.eup %410 }
  0xd1   : > { %v211_v11 = vadd.f32 1.0, %v411_v10 }
  0xd3   : > { %412 = vrcp.f32 %v211_v11 }
  0xdd   : > { %v413_v12 = vpop.eup %412 }
  0xde   : > { %v214_v13 = vmul.f32 %v413_v12, %v194_v4 }
  0xe0   : > { %215 = vst [vmem:[%s189_s5] sm:$0xf] %v214_v13 }
  0xe1   : > { %457 = shalt.err (!%p454_p6)
}
  0xe2   : > { %s458_s26 = scalar_lea.hbm %s673_s16, 64  ;;  %s462_s29 = scalar_lea.hbm %s724_s2, 128 }
  0xe3   : > { %p459_p4 = scmp.ne.s32.totalorder %s673_s16, %s458_s26  ;;  %p463_p1 = scmp.lt.u32.totalorder %s673_s16, %s724_s2 }
  0xe4   : > { %p464_p2 = scmp.lt.u32.totalorder %s462_s29, %s458_s26  ;;  %p466_p8 = scmp.lt.u32.totalorder %s458_s26, %s673_s16 }
  0xe5   : > { %p460_p10 = pnand %p459_p4, %p733_p9 }
  0xe6   : > { %p465_p5 = por %p464_p2, %p463_p1 }
  0xe7   : > { %p461_p12 = pneg %p460_p10 }
  0xe8   : > { %p467_p11 = por %p466_p8, %p465_p5 }
  0xea   : > { %p468_p0 = pnand %p467_p11, %p461_p12 }
  0xec   : > { %471 = shalt.err (!%p468_p0)
}
  0xed   : > { %346 = dma.vmem_to_hbm [thread:$0]  (%p733_p9), %s675_s6, 64, %s673_s16, %s217_s18  }
  0xee PF: > { %s244_s30 = sand.u32 1, %s506_s9   ;;  %p734_p7 = scmp.ne.s32.totalorder %s729_s24, 0 }
  0xef   : > { %p735_p13 = scmp.ge.s32.totalorder %s526_s14, 2  ;;  %s245_s4 = scalar_lea.sflag [#allocation4], %s244_s30 }
  0xf1   : > { %p353_p3 = pnand %p735_p13, %p734_p7 }
  0xf3   : > { %501 = dma.done.wait (!%p353_p3), %s245_s4, 64  }
  0xf4   : > { %503 = vsyncadd (!%p353_p3), %s245_s4, 4294967232  ;;  %s18_s14 = sadd.s32 1, %s526_s14   ;;  %s736_s9 = smov %s510_s10 }
  0xf5   : > { %p15_p6 = scmp.ge.s32.totalorder %s18_s14, 4   ;;  %s737_s10 = smov %s514_s11 }
  0xf6   : > { %s738_s11 = smov %s603_s23  ;;  %s739_s12 = smov %s522_s13 }
  0xf7   : > { %s740_s13 = smov %s742_s17  ;;  %17 = sbr.rel (!%p15_p6) target bundleno = 6 (0x6), region = 76 }
  0xfe   :  { %250 = vsyncpa [#allocation3], 1 }
  0xff   :  { %252 = vsyncpa [#allocation3 + $0x1], 1 }
 0x100   :  { %253 = vsyncpa [#allocation4], 1 }
 0x101   :  { %255 = vsyncpa [#allocation4 + $0x1], 1 }

</bundles_post_ra>
